<compile_context>
chip_gen: v5e
topology: v5e:2x2
jax: 0.10.0
libtpu: 0.0.40
codegen_flags: <defaults>
</compile_context>

<pallas_src>
import jax
import jax.numpy as jnp
from jax.experimental import pallas as pl
from jax.experimental.pallas import tpu as pltpu


def _round_up(x, m):
    return (x + m - 1) // m * m


def _cswiglu_kernel(x_ref, wgu_ref, wd_ref, o_ref):
    # x_ref:   (1, C, TP)   pixels on the lane axis
    # wgu_ref: (8C, C)      fused [gate; up] weights
    # wd_ref:  (C, 4C)      down-projection weights
    # o_ref:   (1, C, TP)
    x = x_ref[0]                                                        # (C, TP)
    hid = wd_ref.shape[1]                                               # 4C
    gu = jnp.dot(wgu_ref[...], x, preferred_element_type=jnp.float32)  # (8C, TP)
    g = gu[:hid]
    u = gu[hid:]
    h = (g * jax.nn.sigmoid(g)) * u                                     # SiLU(gate)*up, f32
    y = jnp.dot(wd_ref[...], h.astype(wd_ref.dtype),
                preferred_element_type=jnp.float32)                     # (C, TP)
    o_ref[0] = y.astype(o_ref.dtype)


def cswiglu_pallas(x_nchw, wg, wu, wd, *, tile_pixels=1024,
                   compute_dtype=jnp.bfloat16):
    """Fused CSwiGLU. x_nchw: (B,C,H,W); wg/wu: (4C,C,1,1); wd: (C,4C,1,1)."""
    B, C, H, W = x_nchw.shape
    hid = wg.shape[0]                        # 4 * C
    P = H * W
    out_dtype = x_nchw.dtype

    # 1x1-conv weights (out, in, 1, 1) -> (out, in); fuse gate & up rows.
    wgu_m = jnp.concatenate([wg[:, :, 0, 0], wu[:, :, 0, 0]], axis=0)   # (8C, C)
    wgu_m = wgu_m.astype(compute_dtype)
    wd_m = wd[:, :, 0, 0].astype(compute_dtype)                          # (C, 4C)

    # Pixels-as-lanes: NCHW -> (B, C, P) is a pure reshape (no transpose).
    x_rows = x_nchw.reshape(B, C, P).astype(compute_dtype)

    # Lane tile: multiple of 128, at most tile_pixels, covering P (padded tail).
    tile_p = max(128, min(_round_up(tile_pixels, 128), _round_up(P, 128)))
    p_pad = _round_up(P, tile_p)
    if p_pad != P:
        x_rows = jnp.pad(x_rows, ((0, 0), (0, 0), (0, p_pad - P)))

    grid = (B, p_pad // tile_p)

    # Explicit scoped-VMEM budget: double-buffered x/out tiles, weights
    # (worst-case double-buffered), f32 intermediates, plus 2x slack.
    cbytes = jnp.dtype(compute_dtype).itemsize
    obytes = jnp.dtype(out_dtype).itemsize
    vmem = (2 * C * tile_p * cbytes                   # x tiles
            + 2 * C * tile_p * obytes                 # out tiles
            + 2 * (2 * hid * C + C * hid) * cbytes    # weights
            + (2 * hid + hid + C) * tile_p * 4)       # f32 gu / h / y
    vmem_limit = int(min(max(2 * vmem, 4 << 20), 48 << 20))

    def run(single_buffer_weights):
        w_kwargs = ({"pipeline_mode": pl.Buffered(1)}
                    if single_buffer_weights else {})
        return pl.pallas_call(
            _cswiglu_kernel,
            out_shape=jax.ShapeDtypeStruct((B, C, p_pad), out_dtype),
            grid_spec=pltpu.PrefetchScalarGridSpec(
                num_scalar_prefetch=0,
                grid=grid,
                in_specs=[
                    pl.BlockSpec((1, C, tile_p), lambda b, p: (b, 0, p)),     # x
                    pl.BlockSpec((2 * hid, C), lambda b, p: (0, 0), **w_kwargs),  # Wg|Wu
                    pl.BlockSpec((C, hid), lambda b, p: (0, 0), **w_kwargs),      # Wd
                ],
                out_specs=pl.BlockSpec((1, C, tile_p), lambda b, p: (b, 0, p)),
            ),
            compiler_params=pltpu.CompilerParams(
                dimension_semantics=("parallel", "parallel"),
                vmem_limit_bytes=vmem_limit),
        )(x_rows, wgu_m, wd_m)

    try:
        out = run(single_buffer_weights=True)
    except Exception:
        # pipeline_mode=pl.Buffered(1) not supported by this JAX build:
        # fall back to default (double-buffered) weight pipelining.
        out = run(single_buffer_weights=False)

    return out[:, :, :P].reshape(B, C, H, W)


def _init_params(key, features, dtype=jnp.float32):
    """Deterministic Conv2d-style init: U(-1/sqrt(fan_in), 1/sqrt(fan_in))."""
    k1, k2, k3 = jax.random.split(key, 3)
    hid = 4 * features

    def u(k, shape, fan_in):
        bound = 1.0 / (fan_in ** 0.5)
        return jax.random.uniform(k, shape, dtype, minval=-bound, maxval=bound)

    wg = u(k1, (hid, features, 1, 1), features)
    wu = u(k2, (hid, features, 1, 1), features)
    wd = u(k3, (features, hid, 1, 1), hid)
    return wg, wu, wd


def _reference(x_nchw, wg, wu, wd):
    # Plain-JAX reference of the same math (1x1 convs as einsum over channels).
    def conv1x1(x, w):  # x: (B,C,H,W), w: (O,C,1,1)
        return jnp.einsum("bchw,oc->bohw", x, w[:, :, 0, 0])
    g = conv1x1(x_nchw, wg)
    u = conv1x1(x_nchw, wu)
    h = (g * jax.nn.sigmoid(g)) * u
    return conv1x1(h, wd)


if __name__ == "__main__":
    features = 4
    B, H, W = 2, 16, 16

    key = jax.random.PRNGKey(0)
    kx, kp = jax.random.split(key)
    x = jax.random.normal(kx, (B, features, H, W), dtype=jnp.float32)
    wg, wu, wd = _init_params(kp, features)

    y_ref = _reference(x, wg, wu, wd)

    # f32 MXU path (tight tolerance).
    y32 = jax.block_until_ready(
        cswiglu_pallas(x, wg, wu, wd, compute_dtype=jnp.float32))
    assert y32.shape == (B, features, H, W)
    assert jnp.allclose(y32, y_ref, atol=1e-4, rtol=1e-4)

    # Default bf16 MXU path (f32 accumulation, f32 SiLU*up inside the kernel).
    y16 = jax.block_until_ready(cswiglu_pallas(x, wg, wu, wd))
    assert y16.dtype == x.dtype
    assert jnp.allclose(y16, y_ref, atol=5e-2, rtol=5e-2)

    # Non-128-divisible spatial size exercises the padded-tail path
    # (the old hard `N % tile == 0` assert is gone).
    x_odd = jax.random.normal(kx, (B, features, 10, 10), dtype=jnp.float32)
    y_odd = jax.block_until_ready(
        cswiglu_pallas(x_odd, wg, wu, wd, compute_dtype=jnp.float32))
    assert jnp.allclose(y_odd, _reference(x_odd, wg, wu, wd),
                        atol=1e-4, rtol=1e-4)

    print("KERNEL_OK")
</pallas_src>

<mosaic_0001>
module attributes {stable_mosaic.version = 11 : i64} {
  func.func @_cswiglu_kernel(%arg0: i32, %arg1: i32, %arg2: memref<1x4x256xf32, #tpu.memory_space<vmem>>, %arg3: memref<32x4xf32, #tpu.memory_space<vmem>>, %arg4: memref<4x16xf32, #tpu.memory_space<vmem>>, %arg5: memref<1x4x256xf32, #tpu.memory_space<vmem>>) attributes {dimension_semantics = [#tpu.dimension_semantics<parallel>, #tpu.dimension_semantics<parallel>], iteration_bounds = array<i64: 2, 1>, scalar_prefetch = 0 : i64, scratch_operands = 0 : i64, tpu.core_type = #tpu.core_type<tc>, window_params = [{transform_indices = @transform_0, window_bounds = array<i64: 1, 4, 256>}, {pipeline_mode = #tpu.pipeline_mode<synchronous>, transform_indices = @transform_1, window_bounds = array<i64: 32, 4>}, {pipeline_mode = #tpu.pipeline_mode<synchronous>, transform_indices = @transform_2, window_bounds = array<i64: 4, 16>}, {transform_indices = @transform_3, window_bounds = array<i64: 1, 4, 256>}]} {
    %c0 = arith.constant 0 : index
    %c0_0 = arith.constant 0 : index
    %c0_1 = arith.constant 0 : index
    %0 = vector.load %arg2[%c0, %c0_0, %c0_1] : memref<1x4x256xf32, #tpu.memory_space<vmem>>, vector<1x4x256xf32>
    %1 = vector.shape_cast %0 : vector<1x4x256xf32> to vector<4x256xf32>
    %c0_2 = arith.constant 0 : index
    %c0_3 = arith.constant 0 : index
    %2 = vector.load %arg3[%c0_2, %c0_3] : memref<32x4xf32, #tpu.memory_space<vmem>>, vector<32x4xf32>
    %cst = arith.constant dense<0.000000e+00> : vector<32x256xf32>
    %3 = tpu.matmul %2, %1, %cst {dimension_numbers = #tpu.dot_dimension_numbers<[1], [0], [0], [1], [0, 0, 1, 1], [], []>} : vector<32x4xf32>, vector<4x256xf32>, vector<32x256xf32> -> vector<32x256xf32>
    %4 = vector.extract_strided_slice %3 {offsets = [0, 0], sizes = [16, 256], strides = [1, 1]} : vector<32x256xf32> to vector<16x256xf32>
    %5 = vector.extract_strided_slice %3 {offsets = [16, 0], sizes = [16, 256], strides = [1, 1]} : vector<32x256xf32> to vector<16x256xf32>
    %6 = arith.negf %4 : vector<16x256xf32>
    %7 = math.exp %6 : vector<16x256xf32>
    %cst_4 = arith.constant 1.000000e+00 : f32
    %8 = vector.broadcast %cst_4 : f32 to vector<16x256xf32>
    %9 = arith.addf %8, %7 : vector<16x256xf32>
    %10 = arith.divf %8, %9 : vector<16x256xf32>
    %11 = arith.mulf %4, %10 : vector<16x256xf32>
    %12 = arith.mulf %11, %5 : vector<16x256xf32>
    %c0_5 = arith.constant 0 : index
    %c0_6 = arith.constant 0 : index
    %13 = vector.load %arg4[%c0_5, %c0_6] : memref<4x16xf32, #tpu.memory_space<vmem>>, vector<4x16xf32>
    %cst_7 = arith.constant dense<0.000000e+00> : vector<4x256xf32>
    %14 = tpu.matmul %13, %12, %cst_7 {dimension_numbers = #tpu.dot_dimension_numbers<[1], [0], [0], [1], [0, 0, 1, 1], [], []>} : vector<4x16xf32>, vector<16x256xf32>, vector<4x256xf32> -> vector<4x256xf32>
    %c0_8 = arith.constant 0 : index
    %c0_9 = arith.constant 0 : index
    %c0_10 = arith.constant 0 : index
    %15 = vector.load %arg5[%c0_8, %c0_9, %c0_10] : memref<1x4x256xf32, #tpu.memory_space<vmem>>, vector<1x4x256xf32>
    %16 = vector.shape_cast %15 : vector<1x4x256xf32> to vector<4x256xf32>
    %17 = vector.shape_cast %14 : vector<4x256xf32> to vector<1x4x256xf32>
    tpu.vector_store %arg5[%c0_8, %c0_9, %c0_10], %17 {strides = array<i32>} : memref<1x4x256xf32, #tpu.memory_space<vmem>>, vector<1x4x256xf32>,
    return
  }
  func.func @transform_0(%arg0: i32, %arg1: i32) -> (i32, i32, i32) {
    %c0_i32 = arith.constant 0 : i32
    %c0_i32_0 = arith.constant 0 : i32
    return %arg0, %c0_i32, %arg1 : i32, i32, i32
  }
  func.func @transform_1(%arg0: i32, %arg1: i32) -> (i32, i32) {
    %c0_i32 = arith.constant 0 : i32
    %c0_i32_0 = arith.constant 0 : i32
    %c0_i32_1 = arith.constant 0 : i32
    return %c0_i32, %c0_i32_0 : i32, i32
  }
  func.func @transform_2(%arg0: i32, %arg1: i32) -> (i32, i32) {
    %c0_i32 = arith.constant 0 : i32
    %c0_i32_0 = arith.constant 0 : i32
    %c0_i32_1 = arith.constant 0 : i32
    return %c0_i32, %c0_i32_0 : i32, i32
  }
  func.func @transform_3(%arg0: i32, %arg1: i32) -> (i32, i32, i32) {
    %c0_i32 = arith.constant 0 : i32
    %c0_i32_0 = arith.constant 0 : i32
    return %arg0, %c0_i32, %arg1 : i32, i32, i32
  }
}

module attributes {stable_mosaic.version = 11 : i64} {
  func.func @_cswiglu_kernel(%arg0: i32, %arg1: i32, %arg2: memref<1x4x256xf32, #tpu.memory_space<vmem>>, %arg3: memref<32x4xf32, #tpu.memory_space<vmem>>, %arg4: memref<4x16xf32, #tpu.memory_space<vmem>>, %arg5: memref<1x4x256xf32, #tpu.memory_space<vmem>>) attributes {dimension_semantics = [#tpu.dimension_semantics<parallel>, #tpu.dimension_semantics<parallel>], iteration_bounds = array<i64: 2, 1>, scalar_prefetch = 0 : i64, scratch_operands = 0 : i64, tpu.core_type = #tpu.core_type<tc>, window_params = [{transform_indices = @transform_0, window_bounds = array<i64: 1, 4, 256>}, {pipeline_mode = #tpu.pipeline_mode<synchronous>, transform_indices = @transform_1, window_bounds = array<i64: 32, 4>}, {pipeline_mode = #tpu.pipeline_mode<synchronous>, transform_indices = @transform_2, window_bounds = array<i64: 4, 16>}, {transform_indices = @transform_3, window_bounds = array<i64: 1, 4, 256>}]} {
    %c0 = arith.constant 0 : index
    %c0_0 = arith.constant 0 : index
    %c0_1 = arith.constant 0 : index
    %0 = vector.load %arg2[%c0, %c0_0, %c0_1] : memref<1x4x256xf32, #tpu.memory_space<vmem>>, vector<1x4x256xf32>
    %1 = vector.shape_cast %0 : vector<1x4x256xf32> to vector<4x256xf32>
    %c0_2 = arith.constant 0 : index
    %c0_3 = arith.constant 0 : index
    %2 = vector.load %arg3[%c0_2, %c0_3] : memref<32x4xf32, #tpu.memory_space<vmem>>, vector<32x4xf32>
    %cst = arith.constant dense<0.000000e+00> : vector<32x256xf32>
    %3 = tpu.matmul %2, %1, %cst {dimension_numbers = #tpu.dot_dimension_numbers<[1], [0], [0], [1], [0, 0, 1, 1], [], []>} : vector<32x4xf32>, vector<4x256xf32>, vector<32x256xf32> -> vector<32x256xf32>
    %4 = vector.extract_strided_slice %3 {offsets = [0, 0], sizes = [16, 256], strides = [1, 1]} : vector<32x256xf32> to vector<16x256xf32>
    %5 = vector.extract_strided_slice %3 {offsets = [16, 0], sizes = [16, 256], strides = [1, 1]} : vector<32x256xf32> to vector<16x256xf32>
    %6 = arith.negf %4 : vector<16x256xf32>
    %7 = math.exp %6 : vector<16x256xf32>
    %cst_4 = arith.constant 1.000000e+00 : f32
    %8 = vector.broadcast %cst_4 : f32 to vector<16x256xf32>
    %9 = arith.addf %8, %7 : vector<16x256xf32>
    %10 = arith.divf %8, %9 : vector<16x256xf32>
    %11 = arith.mulf %4, %10 : vector<16x256xf32>
    %12 = arith.mulf %11, %5 : vector<16x256xf32>
    %c0_5 = arith.constant 0 : index
    %c0_6 = arith.constant 0 : index
    %13 = vector.load %arg4[%c0_5, %c0_6] : memref<4x16xf32, #tpu.memory_space<vmem>>, vector<4x16xf32>
    %cst_7 = arith.constant dense<0.000000e+00> : vector<4x256xf32>
    %14 = tpu.matmul %13, %12, %cst_7 {dimension_numbers = #tpu.dot_dimension_numbers<[1], [0], [0], [1], [0, 0, 1, 1], [], []>} : vector<4x16xf32>, vector<16x256xf32>, vector<4x256xf32> -> vector<4x256xf32>
    %c0_8 = arith.constant 0 : index
    %c0_9 = arith.constant 0 : index
    %c0_10 = arith.constant 0 : index
    %15 = vector.load %arg5[%c0_8, %c0_9, %c0_10] : memref<1x4x256xf32, #tpu.memory_space<vmem>>, vector<1x4x256xf32>
    %16 = vector.shape_cast %15 : vector<1x4x256xf32> to vector<4x256xf32>
    %17 = vector.shape_cast %14 : vector<4x256xf32> to vector<1x4x256xf32>
    tpu.vector_store %arg5[%c0_8, %c0_9, %c0_10], %17 {strides = array<i32>} : memref<1x4x256xf32, #tpu.memory_space<vmem>>, vector<1x4x256xf32>,
    return
  }
  func.func @transform_0(%arg0: i32, %arg1: i32) -> (i32, i32, i32) {
    %c0_i32 = arith.constant 0 : i32
    %c0_i32_0 = arith.constant 0 : i32
    return %arg0, %c0_i32, %arg1 : i32, i32, i32
  }
  func.func @transform_1(%arg0: i32, %arg1: i32) -> (i32, i32) {
    %c0_i32 = arith.constant 0 : i32
    %c0_i32_0 = arith.constant 0 : i32
    %c0_i32_1 = arith.constant 0 : i32
    return %c0_i32, %c0_i32_0 : i32, i32
  }
  func.func @transform_2(%arg0: i32, %arg1: i32) -> (i32, i32) {
    %c0_i32 = arith.constant 0 : i32
    %c0_i32_0 = arith.constant 0 : i32
    %c0_i32_1 = arith.constant 0 : i32
    return %c0_i32, %c0_i32_0 : i32, i32
  }
  func.func @transform_3(%arg0: i32, %arg1: i32) -> (i32, i32, i32) {
    %c0_i32 = arith.constant 0 : i32
    %c0_i32_0 = arith.constant 0 : i32
    return %arg0, %c0_i32, %arg1 : i32, i32, i32
  }
}

</mosaic_0001>

<bundles_post_ra>
// kernel: tpu_custom_call.1
= control target key start
LH: loop header
LB: loop body
LE: loop exit
PB: predicated region body
PF: predicated region fallthrough
CT: control target
= control target key end

     0   :  { %8 = vsyncpa [#allocation3], 0  ;;  %s873_s0 = inlined_call_operand.vmem [shape: f32[2,4,256], index: 0, kind: input, shape index: {}]   ;;  %s874_s1 = inlined_call_operand.vmem [shape: f32[32,4], index: 1, kind: input, shape index: {}]   ;;  %s875_s2 = inlined_call_operand.vmem [shape: f32[4,16], index: 2, kind: input, shape index: {}]   ;;  %s876_s3 = inlined_call_operand.hbm [shape: f32[2,4,256], index: 3, kind: output, shape index: {}]  }
   0x1   :  { %10 = vsyncpa [#allocation3 + $0x1], 0  ;;  %s719_s12 = smov 0   ;;  %s721_s13 = smov 0  }
   0x2   :  { %s723_s14 = smov 0   ;;  %s725_s15 = smov 0  }
   0x3   :  { %s727_s16 = smov 0   ;;  %s729_s17 = smov 0  }
   0x4 LB: > { %s515_s18 = sadd.s32 4294967295, %s697_s17   ;;  %s516_s19 = sadd.s32 4294967294, %s697_s17   ;;  %s697_s17 = sphi %s729_s17, %s16_s17   ;;  %s693_s16 = sphi %s727_s16, %s887_s16   ;;  %s689_s15 = sphi %s725_s15, %s886_s15   ;;  %s685_s14 = sphi %s723_s14, %s885_s14   ;;  %s681_s13 = sphi %s721_s13, %s884_s13   ;;  %s677_s12 = sphi %s719_s12, %s883_s12  }
   0x5   : > { %s28_s20 = sadd.s32 1, %s693_s16  ;;  %s107_s21 = sadd.s32 1, %s685_s14 }
   0x6   : > { %p30_p0 = scmp.ge.s32.totalorder %s28_s20, 2  ;;  %p117_p1 = scmp.ne.s32.totalorder %s685_s14, %s681_s13 }
   0x7   : > { %p118_p2 = scmp.eq.s32.totalorder %s515_s18, 1  ;;  %p123_p3 = scmp.ne.s32.totalorder %s681_s13, %s677_s12 }
   0x8   : > { %s889_s20 = smov (%p30_p0, %s28_s20), 0  ;;  %p124_p5 = scmp.eq.s32.totalorder %s516_s19, 1 }
   0x9   : > { %p759_p4 = por %p118_p2, %p117_p1  ;;  %s102_s23 = ssub.s32 %s693_s16, %s889_s20 }
   0xa   : > { %p519_p6 = scmp.ge.s32.totalorder %s697_s17, 1  ;;  %p105_p7 = scmp.eq.s32.totalorder %s102_s23, 0 }
   0xb   : > { %p766_p8 = por %p124_p5, %p123_p3  ;;  %p161_p9 = scmp.lt.s32.totalorder %s697_s17, 3 }
   0xc   : > { %s772_s25 = scalar_select %p105_p7, %s685_s14, %s107_s21  }
   0xd   : > { %p162_p10 = pnand %p519_p6, %p161_p9 }
   0xe   : > { %p190_p11 = scmp.lt.s32.totalorder (!%p162_p10), %s689_s15, 1  ;;  %s186_s21 = sand.u32 (!%p162_p10), 1, %s681_s13  }
   0xf   : > { %165 = sbr.rel (%p162_p10) target bundleno = 344 (0x158), region = 32  ;;  %s520_s23 = sshll.u32 (!%p162_p10), %s186_s21, 3 }
  0x10   : > { %s421_s6 = scalar_lea.sflag (!%p162_p10), [#allocation3], %s186_s21  ;;  %s639_s10 = scalar_lea.hbm (!%p162_p10), %s876_s3, 16 }
  0x14   : > { %s191_s26 = scalar_select %p190_p11, %s689_s15, 1  ;;  %vm222_vm0 = vcmask 1043456   ;;  %v201_v1 = vld [vmem:[%s874_s1] sm:$0xff]  ;;  %vm209_vm1 = vcmask 31744   ;;  %v204_v4 = vld [vmem:[%s874_s1 + $0x18] sm:$0xff]  ;;  %v202_v5 = vld [vmem:[%s874_s1 + $0x8] sm:$0xff] }
  0x15   : > { %v203_v6 = vld [vmem:[%s874_s1 + $0x10] sm:$0xff] }
  0x16   : > { %s544_s27 = sshll.u32 %s191_s26, 3  ;;  %s545_s26 = sshll.u32 %s689_s15, 3 }
  0x17   : > { %s197_s30 = scalar_lea.vmem %s873_s0, %s544_s27  ;;  %s434_s29 = scalar_lea.hbm %s876_s3, %s545_s26 }
  0x18   : > { %v200_v0 = vld [vmem:[%s197_s30] sm:$0xff]  ;;  %s188_s30 = scalar_lea.vmem [#allocation2], %s520_s23  ;;  %s438_s5 = sshll.u32 %s434_s29, 4  ;;  %s439_s5 = int_to_ptr.hbm [resolvable:$true] %s438_s5 }
  0x19   : > { %206 = vst [vmem:[#allocation1] ss:$2 sm:$0xff] %v200_v0  ;;  %s436_s4 = sshll.u32 %s188_s30, 4  ;;  %s633_s7 = sshra.s32 %s439_s5, 4  ;;  %s437_s4 = int_to_ptr.vmem [resolvable:$true] %s436_s4  ;;  %s634_s7 = int_to_ptr.hbm [resolvable:$true] %s633_s7 }
  0x1a   : > { %s635_s15 = scalar_lea.hbm %s634_s7, 8  ;;  %p640_p1 = scmp.lt.s32.totalorder %s634_s7, %s876_s3 }
  0x1b   : > { %p636_p12 = scmp.ne.s32.totalorder %s634_s7, %s635_s15  ;;  %p641_p2 = scmp.lt.s32.totalorder %s639_s10, %s635_s15 }
  0x1d   : > { %p637_p13 = pnand %p636_p12, %p759_p4  ;;  %p642_p3 = por %p641_p2, %p640_p1 }
  0x1f   : > { %p638_p0 = pneg %p637_p13 }
  0x20   : > { %v207_v2 = vld.sshfl [vmem:[#allocation1] sm:$0xff pattern:$0x75316420]  ;;  %v208_v3 = vld.sshfl [vmem:[#allocation1 + $0x8] sm:$0xff pattern:$0x75316420] }
  0x21   : > { %523 = vmatpush.msk.msra.mxu0 %vm222_vm0, %v207_v2  ;;  %528 = vmatpush.msk.msra.mxu1 %vm222_vm0, %v208_v3  ;;  %p643_p5 = pnand %p642_p3, %p638_p0 }
  0x22   : > { %524 = vmatmul.msk.f32.vlgmr.msra.gmra.mxu0 %vm209_vm1, %v201_v1  ;;  %529 = vmatmul.msk.f32.vlgmr.msra.gmra.mxu1 %vm209_vm1, %v201_v1 }
  0x23   : > { %546 = vmatpush.msk.msra.mxu2 %vm222_vm0, %v207_v2  ;;  %547 = vmatpush.msk.msra.mxu3 %vm222_vm0, %v208_v3 }
  0x24   : > { %527 = vmatmul.msk.f32.vlgmr.msra.gmra.mxu2 %vm209_vm1, %v204_v4  ;;  %532 = vmatmul.msk.f32.vlgmr.msra.gmra.mxu3 %vm209_vm1, %v204_v4 }
  0x2a   : > { %525 = vmatmul.msk.f32.gmra.mxu0 %vm209_vm1, %v202_v5  ;;  %530 = vmatmul.msk.f32.gmra.mxu1 %vm209_vm1, %v202_v5 }
  0x32   : > { %526 = vmatmul.msk.f32.gmra.mxu0 %vm209_vm1, %v203_v6  ;;  %531 = vmatmul.msk.f32.gmra.mxu1 %vm209_vm1, %v203_v6 }
  0x9f   : > { %v803_v7 = vpop.f32.mrf.mxu0  ;;  %v805_v8 = vpop.f32.mrf.mxu1 }
  0xa0   : > { %v533_v9 = vmul.f32 -1.442695, %v803_v7  ;;  %v534_v10 = vmul.f32 -1.442695, %v805_v8 }
  0xa2   : > { %603 = vpow2.f32 %v533_v9 }
  0xa3   : > { %605 = vpow2.f32 %v534_v10 }
  0xa7   : > { %v809_v11 = vpop.f32.mrf.mxu0  ;;  %v811_v12 = vpop.f32.mrf.mxu1 }
  0xa8   : > { %v604_v13 = vpop.eup %603  ;;  %v535_v14 = vmul.f32 -1.442695, %v809_v11  ;;  %v536_v17 = vmul.f32 -1.442695, %v811_v12  ;;  %v253_v61 = vpop.f32.mrf.mxu2 }
  0xa9   : > { %v606_v15 = vpop.eup %605  ;;  %v297_v16 = vadd.f32 1.0, %v604_v13  ;;  %v282_v6 = vpop.f32.mrf.mxu3 }
  0xaa   : > { %v298_v18 = vadd.f32 1.0, %v606_v15  ;;  %607 = vpow2.f32 %v535_v14 }
  0xab   : > { %609 = vrcp.f32 %v297_v16  ;;  %vm306_vm3 = vweird.f32 %v297_v16  ;;  %v310_v34 = vand.u32 2147483647, %v297_v16  ;;  %v312_v35 = vand.u32 2147483648, %v297_v16 }
  0xac   : > { %611 = vrcp.f32 %v298_v18  ;;  %vm321_vm4 = vweird.f32 %v298_v18  ;;  %v325_v37 = vand.u32 2147483647, %v298_v18  ;;  %v327_v42 = vand.u32 2147483648, %v298_v18 }
  0xad   : > { %613 = vpow2.f32 %v536_v17  ;;  %vm311_vm8 = vcmp.eq.f32.partialorder %v310_v34, 8.507059e+37  ;;  %v313_v47 = vor.u32 1.1754944e-38, %v312_v35 }
  0xae   : > { %v328_v57 = vor.u32 1.1754944e-38, %v327_v42  ;;  %vm326_vm14 = vcmp.eq.f32.partialorder %v325_v37, 8.507059e+37 }
  0xaf   : > { %v250_v3 = vpop.f32.mrf.mxu0  ;;  %v279_v14 = vpop.f32.mrf.mxu1 }
  0xb0   : > { %v608_v19 = vpop.eup %607 }
  0xb1   : > { %v610_v20 = vpop.eup %609  ;;  %v299_v21 = vadd.f32 1.0, %v608_v19 }
  0xb2   : > { %v612_v22 = vpop.eup %611  ;;  %v302_v23 = vmul.f32 %v610_v20, %v297_v16  ;;  %vm307_vm2 = vweird.f32 %v610_v20 }
  0xb3   : > { %v614_v24 = vpop.eup %613  ;;  %v317_v25 = vmul.f32 %v612_v22, %v298_v18  ;;  %615 = vrcp.f32 %v299_v21  ;;  %v342_v39 = vand.u32 2147483648, %v299_v21  ;;  %vm815_vm5 = vmor %vm306_vm3, %vm307_vm2  ;;  %vm322_vm6 = vweird.f32 %v612_v22 }
  0xb4   : > { %v303_v26 = vsub.f32 1.0, %v302_v23  ;;  %v300_v27 = vadd.f32 1.0, %v614_v24  ;;  %v340_v46 = vand.u32 2147483647, %v299_v21  ;;  %vm336_vm9 = vweird.f32 %v299_v21  ;;  %vm822_vm10 = vmor %vm321_vm4, %vm322_vm6 }
  0xb5   : > { %v318_v28 = vsub.f32 1.0, %v317_v25  ;;  %v343_v51 = vor.u32 1.1754944e-38, %v342_v39  ;;  %vm370_vm3 = vcmask 130048  }
  0xb6   : > { %v304_v29 = vmul.f32 %v610_v20, %v303_v26  ;;  %617 = vrcp.f32 %v300_v27  ;;  %v355_v52 = vand.u32 2147483647, %v300_v27  ;;  %v357_v53 = vand.u32 2147483648, %v300_v27 }
  0xb7   : > { %v319_v31 = vmul.f32 %v612_v22, %v318_v28  ;;  %vm341_vm13 = vcmp.eq.f32.partialorder %v340_v46, 8.507059e+37  ;;  %vm351_vm15 = vweird.f32 %v300_v27 }
  0xb8   : > { %v305_v32 = vadd.f32 %v610_v20, %v304_v29  ;;  %v358_v1 = vor.u32 1.1754944e-38, %v357_v53  ;;  %vm356_vm2 = vcmp.eq.f32.partialorder %v355_v52, 8.507059e+37 }
  0xb9   : > { %v616_v30 = vpop.eup %615  ;;  %v320_v41 = vadd.f32 %v612_v22, %v319_v31 }
  0xba   : > { %v332_v33 = vmul.f32 %v616_v30, %v299_v21  ;;  %v309_v44 = vsel %vm815_vm5, %v610_v20, %v305_v32  ;;  %vm337_vm7 = vweird.f32 %v616_v30 }
  0xbb   : > { %v314_v54 = vsel %vm311_vm8, %v313_v47, %v309_v44  ;;  %v324_v55 = vsel %vm822_vm10, %v612_v22, %v320_v41  ;;  %vm338_vm11 = vmor %vm336_vm9, %vm337_vm7 }
  0xbc   : > { %v618_v36 = vpop.eup %617  ;;  %v333_v38 = vsub.f32 1.0, %v332_v33  ;;  %v361_v62 = vmul.f32 %v314_v54, %v803_v7  ;;  %v329_v63 = vsel %vm326_vm14, %v328_v57, %v324_v55 }
  0xbd   : > { %v347_v43 = vmul.f32 %v618_v36, %v300_v27  ;;  %vm352_vm12 = vweird.f32 %v618_v36  ;;  %v362_v9 = vmul.f32 %v329_v63, %v805_v8 }
  0xbe   : > { %v334_v45 = vmul.f32 %v616_v30, %v333_v38  ;;  %vm353_vm1 = vmor %vm351_vm15, %vm352_vm12  ;;  %v365_v13 = vmul.f32 %v361_v62, %v250_v3 }
  0xbf   : > { %v348_v48 = vsub.f32 1.0, %v347_v43  ;;  %v366_v15 = vmul.f32 %v362_v9, %v279_v14 }
  0xc0   : > { %v335_v50 = vadd.f32 %v616_v30, %v334_v45 }
  0xc1   : > { %v349_v56 = vmul.f32 %v618_v36, %v348_v48 }
  0xc2   : > { %v339_v58 = vsel %vm338_vm11, %v616_v30, %v335_v50 }
  0xc3   : > { %v344_v59 = vsel %vm341_vm13, %v343_v51, %v339_v58  ;;  %v350_v60 = vadd.f32 %v618_v36, %v349_v56 }
  0xc4   : > { %v363_v0 = vmul.f32 %v344_v59, %v809_v11  ;;  %v369_v11 = vld [vmem:[%s875_s2] sm:$0xf] }
  0xc5   : > { %v354_v2 = vsel %vm353_vm1, %v618_v36, %v350_v60 }
  0xc6   : > { %v359_v4 = vsel %vm356_vm2, %v358_v1, %v354_v2  ;;  %v367_v5 = vmul.f32 %v363_v0, %v253_v61 }
  0xc7   : > { %v364_v10 = vmul.f32 %v359_v4, %v811_v12 }
  0xc8   : > { %388 = vmatpush.msrb.mxu2 %v367_v5 }
  0xc9   : > { %v368_v7 = vmul.f32 %v364_v10, %v282_v6 }
  0xca   : > { %389 = vmatpush.msrb.mxu2 %v365_v13 }
  0xcb   : > { %408 = vmatpush.msrb.mxu3 %v368_v7  ;;  %537 = vmatmul.msk.f32.vlgmr.msrb.gmra.mxu2 %vm370_vm3, %v369_v11 }
  0xcd   : > { %409 = vmatpush.msrb.mxu3 %v366_v15 }
  0xce   : > { %538 = vmatmul.msk.f32.vlgmr.msrb.gmra.mxu3 %vm370_vm3, %v369_v11 }
 0x14e   : > { %v391_v12 = vpop.f32.mrf.mxu2 }
 0x151   : > { %v411_v8 = vpop.f32.mrf.mxu3 }
 0x152   : > { %v416_v16 = vrot.slane %v411_v8, 4 }
 0x154   : > { %v417_v17 = vsel %vm222_vm0, %v391_v12, %v416_v16 }
 0x155   : > { %419 = vst [vmem:[%s188_s30] sm:$0xff] %v417_v17 }
 0x156   : > { %646 = shalt.err (!%p643_p5)
}
 0x157   : > { %548 = dma.vmem_to_hbm [thread:$0]  (%p759_p4), %s437_s4, 128, %s439_s5, %s421_s6  }
 0x158 PF: > { %p554_p6 = scmp.ge.s32.totalorder %s697_s17, 2  ;;  %s450_s19 = sand.u32 1, %s677_s12  }
 0x159   : > { %s451_s21 = scalar_lea.sflag [#allocation3], %s450_s19 }
 0x15a   : > { %p551_p7 = pnand %p554_p6, %p766_p8 }
 0x15c   : > { %p552_p9 = pneg %p551_p7 }
 0x15e   : > { %672 = dma.done.wait (%p552_p9), %s451_s21, 128  }
 0x15f   : > { %674 = vsyncadd (%p552_p9), %s451_s21, 4294967168  ;;  %s16_s17 = sadd.s32 1, %s697_s17   ;;  %s883_s12 = smov %s681_s13 }
 0x160   : > { %p13_p10 = scmp.ge.s32.totalorder %s16_s17, 4   ;;  %s884_s13 = smov %s685_s14 }
 0x161   : > { %s885_s14 = smov %s772_s25  ;;  %s886_s15 = smov %s693_s16 }
 0x162   : > { %s887_s16 = smov %s889_s20  ;;  %15 = sbr.rel (!%p13_p10) target bundleno = 4 (0x4), region = 67 }
 0x167   :  { %457 = vsyncpa [#allocation3], 1 }
 0x168   :  { %459 = vsyncpa [#allocation3 + $0x1], 1 }

// kernel: tpu_custom_call.1
= control target key start
LH: loop header
LB: loop body
LE: loop exit
PB: predicated region body
PF: predicated region fallthrough
CT: control target
= control target key end

     0   :  { %8 = vsyncpa [#allocation3], 0  ;;  %s873_s0 = inlined_call_operand.vmem [shape: f32[2,4,256], index: 0, kind: input, shape index: {}]   ;;  %s874_s1 = inlined_call_operand.vmem [shape: f32[32,4], index: 1, kind: input, shape index: {}]   ;;  %s875_s2 = inlined_call_operand.vmem [shape: f32[4,16], index: 2, kind: input, shape index: {}]   ;;  %s876_s3 = inlined_call_operand.hbm [shape: f32[2,4,256], index: 3, kind: output, shape index: {}]  }
   0x1   :  { %10 = vsyncpa [#allocation3 + $0x1], 0  ;;  %s719_s12 = smov 0   ;;  %s721_s13 = smov 0  }
   0x2   :  { %s723_s14 = smov 0   ;;  %s725_s15 = smov 0  }
   0x3   :  { %s727_s16 = smov 0   ;;  %s729_s17 = smov 0  }
   0x4 LB: > { %s515_s18 = sadd.s32 4294967295, %s697_s17   ;;  %s516_s19 = sadd.s32 4294967294, %s697_s17   ;;  %s697_s17 = sphi %s729_s17, %s16_s17   ;;  %s693_s16 = sphi %s727_s16, %s887_s16   ;;  %s689_s15 = sphi %s725_s15, %s886_s15   ;;  %s685_s14 = sphi %s723_s14, %s885_s14   ;;  %s681_s13 = sphi %s721_s13, %s884_s13   ;;  %s677_s12 = sphi %s719_s12, %s883_s12  }
   0x5   : > { %s28_s20 = sadd.s32 1, %s693_s16  ;;  %s107_s21 = sadd.s32 1, %s685_s14 }
   0x6   : > { %p30_p0 = scmp.ge.s32.totalorder %s28_s20, 2  ;;  %p117_p1 = scmp.ne.s32.totalorder %s685_s14, %s681_s13 }
   0x7   : > { %p118_p2 = scmp.eq.s32.totalorder %s515_s18, 1  ;;  %p123_p3 = scmp.ne.s32.totalorder %s681_s13, %s677_s12 }
   0x8   : > { %s889_s20 = smov (%p30_p0, %s28_s20), 0  ;;  %p124_p5 = scmp.eq.s32.totalorder %s516_s19, 1 }
   0x9   : > { %p759_p4 = por %p118_p2, %p117_p1  ;;  %s102_s23 = ssub.s32 %s693_s16, %s889_s20 }
   0xa   : > { %p519_p6 = scmp.ge.s32.totalorder %s697_s17, 1  ;;  %p105_p7 = scmp.eq.s32.totalorder %s102_s23, 0 }
   0xb   : > { %p766_p8 = por %p124_p5, %p123_p3  ;;  %p161_p9 = scmp.lt.s32.totalorder %s697_s17, 3 }
   0xc   : > { %s772_s25 = scalar_select %p105_p7, %s685_s14, %s107_s21  }
   0xd   : > { %p162_p10 = pnand %p519_p6, %p161_p9 }
   0xe   : > { %p190_p11 = scmp.lt.s32.totalorder (!%p162_p10), %s689_s15, 1  ;;  %s186_s21 = sand.u32 (!%p162_p10), 1, %s681_s13  }
   0xf   : > { %165 = sbr.rel (%p162_p10) target bundleno = 344 (0x158), region = 32  ;;  %s520_s23 = sshll.u32 (!%p162_p10), %s186_s21, 3 }
  0x10   : > { %s421_s6 = scalar_lea.sflag (!%p162_p10), [#allocation3], %s186_s21  ;;  %s639_s10 = scalar_lea.hbm (!%p162_p10), %s876_s3, 16 }
  0x14   : > { %s191_s26 = scalar_select %p190_p11, %s689_s15, 1  ;;  %vm222_vm0 = vcmask 1043456   ;;  %v201_v1 = vld [vmem:[%s874_s1] sm:$0xff]  ;;  %vm209_vm1 = vcmask 31744   ;;  %v204_v4 = vld [vmem:[%s874_s1 + $0x18] sm:$0xff]  ;;  %v202_v5 = vld [vmem:[%s874_s1 + $0x8] sm:$0xff] }
  0x15   : > { %v203_v6 = vld [vmem:[%s874_s1 + $0x10] sm:$0xff] }
  0x16   : > { %s544_s27 = sshll.u32 %s191_s26, 3  ;;  %s545_s26 = sshll.u32 %s689_s15, 3 }
  0x17   : > { %s197_s30 = scalar_lea.vmem %s873_s0, %s544_s27  ;;  %s434_s29 = scalar_lea.hbm %s876_s3, %s545_s26 }
  0x18   : > { %v200_v0 = vld [vmem:[%s197_s30] sm:$0xff]  ;;  %s188_s30 = scalar_lea.vmem [#allocation2], %s520_s23  ;;  %s438_s5 = sshll.u32 %s434_s29, 4  ;;  %s439_s5 = int_to_ptr.hbm [resolvable:$true] %s438_s5 }
  0x19   : > { %206 = vst [vmem:[#allocation1] ss:$2 sm:$0xff] %v200_v0  ;;  %s436_s4 = sshll.u32 %s188_s30, 4  ;;  %s633_s7 = sshra.s32 %s439_s5, 4  ;;  %s437_s4 = int_to_ptr.vmem [resolvable:$true] %s436_s4  ;;  %s634_s7 = int_to_ptr.hbm [resolvable:$true] %s633_s7 }
  0x1a   : > { %s635_s15 = scalar_lea.hbm %s634_s7, 8  ;;  %p640_p1 = scmp.lt.s32.totalorder %s634_s7, %s876_s3 }
  0x1b   : > { %p636_p12 = scmp.ne.s32.totalorder %s634_s7, %s635_s15  ;;  %p641_p2 = scmp.lt.s32.totalorder %s639_s10, %s635_s15 }
  0x1d   : > { %p637_p13 = pnand %p636_p12, %p759_p4  ;;  %p642_p3 = por %p641_p2, %p640_p1 }
  0x1f   : > { %p638_p0 = pneg %p637_p13 }
  0x20   : > { %v207_v2 = vld.sshfl [vmem:[#allocation1] sm:$0xff pattern:$0x75316420]  ;;  %v208_v3 = vld.sshfl [vmem:[#allocation1 + $0x8] sm:$0xff pattern:$0x75316420] }
  0x21   : > { %523 = vmatpush.msk.msra.mxu0 %vm222_vm0, %v207_v2  ;;  %528 = vmatpush.msk.msra.mxu1 %vm222_vm0, %v208_v3  ;;  %p643_p5 = pnand %p642_p3, %p638_p0 }
  0x22   : > { %524 = vmatmul.msk.f32.vlgmr.msra.gmra.mxu0 %vm209_vm1, %v201_v1  ;;  %529 = vmatmul.msk.f32.vlgmr.msra.gmra.mxu1 %vm209_vm1, %v201_v1 }
  0x23   : > { %546 = vmatpush.msk.msra.mxu2 %vm222_vm0, %v207_v2  ;;  %547 = vmatpush.msk.msra.mxu3 %vm222_vm0, %v208_v3 }
  0x24   : > { %527 = vmatmul.msk.f32.vlgmr.msra.gmra.mxu2 %vm209_vm1, %v204_v4  ;;  %532 = vmatmul.msk.f32.vlgmr.msra.gmra.mxu3 %vm209_vm1, %v204_v4 }
  0x2a   : > { %525 = vmatmul.msk.f32.gmra.mxu0 %vm209_vm1, %v202_v5  ;;  %530 = vmatmul.msk.f32.gmra.mxu1 %vm209_vm1, %v202_v5 }
  0x32   : > { %526 = vmatmul.msk.f32.gmra.mxu0 %vm209_vm1, %v203_v6  ;;  %531 = vmatmul.msk.f32.gmra.mxu1 %vm209_vm1, %v203_v6 }
  0x9f   : > { %v803_v7 = vpop.f32.mrf.mxu0  ;;  %v805_v8 = vpop.f32.mrf.mxu1 }
  0xa0   : > { %v533_v9 = vmul.f32 -1.442695, %v803_v7  ;;  %v534_v10 = vmul.f32 -1.442695, %v805_v8 }
  0xa2   : > { %603 = vpow2.f32 %v533_v9 }
  0xa3   : > { %605 = vpow2.f32 %v534_v10 }
  0xa7   : > { %v809_v11 = vpop.f32.mrf.mxu0  ;;  %v811_v12 = vpop.f32.mrf.mxu1 }
  0xa8   : > { %v604_v13 = vpop.eup %603  ;;  %v535_v14 = vmul.f32 -1.442695, %v809_v11  ;;  %v536_v17 = vmul.f32 -1.442695, %v811_v12  ;;  %v253_v61 = vpop.f32.mrf.mxu2 }
  0xa9   : > { %v606_v15 = vpop.eup %605  ;;  %v297_v16 = vadd.f32 1.0, %v604_v13  ;;  %v282_v6 = vpop.f32.mrf.mxu3 }
  0xaa   : > { %v298_v18 = vadd.f32 1.0, %v606_v15  ;;  %607 = vpow2.f32 %v535_v14 }
  0xab   : > { %609 = vrcp.f32 %v297_v16  ;;  %vm306_vm3 = vweird.f32 %v297_v16  ;;  %v310_v34 = vand.u32 2147483647, %v297_v16  ;;  %v312_v35 = vand.u32 2147483648, %v297_v16 }
  0xac   : > { %611 = vrcp.f32 %v298_v18  ;;  %vm321_vm4 = vweird.f32 %v298_v18  ;;  %v325_v37 = vand.u32 2147483647, %v298_v18  ;;  %v327_v42 = vand.u32 2147483648, %v298_v18 }
  0xad   : > { %613 = vpow2.f32 %v536_v17  ;;  %vm311_vm8 = vcmp.eq.f32.partialorder %v310_v34, 8.507059e+37  ;;  %v313_v47 = vor.u32 1.1754944e-38, %v312_v35 }
  0xae   : > { %v328_v57 = vor.u32 1.1754944e-38, %v327_v42  ;;  %vm326_vm14 = vcmp.eq.f32.partialorder %v325_v37, 8.507059e+37 }
  0xaf   : > { %v250_v3 = vpop.f32.mrf.mxu0  ;;  %v279_v14 = vpop.f32.mrf.mxu1 }
  0xb0   : > { %v608_v19 = vpop.eup %607 }
  0xb1   : > { %v610_v20 = vpop.eup %609  ;;  %v299_v21 = vadd.f32 1.0, %v608_v19 }
  0xb2   : > { %v612_v22 = vpop.eup %611  ;;  %v302_v23 = vmul.f32 %v610_v20, %v297_v16  ;;  %vm307_vm2 = vweird.f32 %v610_v20 }
  0xb3   : > { %v614_v24 = vpop.eup %613  ;;  %v317_v25 = vmul.f32 %v612_v22, %v298_v18  ;;  %615 = vrcp.f32 %v299_v21  ;;  %v342_v39 = vand.u32 2147483648, %v299_v21  ;;  %vm815_vm5 = vmor %vm306_vm3, %vm307_vm2  ;;  %vm322_vm6 = vweird.f32 %v612_v22 }
  0xb4   : > { %v303_v26 = vsub.f32 1.0, %v302_v23  ;;  %v300_v27 = vadd.f32 1.0, %v614_v24  ;;  %v340_v46 = vand.u32 2147483647, %v299_v21  ;;  %vm336_vm9 = vweird.f32 %v299_v21  ;;  %vm822_vm10 = vmor %vm321_vm4, %vm322_vm6 }
  0xb5   : > { %v318_v28 = vsub.f32 1.0, %v317_v25  ;;  %v343_v51 = vor.u32 1.1754944e-38, %v342_v39  ;;  %vm370_vm3 = vcmask 130048  }
  0xb6   : > { %v304_v29 = vmul.f32 %v610_v20, %v303_v26  ;;  %617 = vrcp.f32 %v300_v27  ;;  %v355_v52 = vand.u32 2147483647, %v300_v27  ;;  %v357_v53 = vand.u32 2147483648, %v300_v27 }
  0xb7   : > { %v319_v31 = vmul.f32 %v612_v22, %v318_v28  ;;  %vm341_vm13 = vcmp.eq.f32.partialorder %v340_v46, 8.507059e+37  ;;  %vm351_vm15 = vweird.f32 %v300_v27 }
  0xb8   : > { %v305_v32 = vadd.f32 %v610_v20, %v304_v29  ;;  %v358_v1 = vor.u32 1.1754944e-38, %v357_v53  ;;  %vm356_vm2 = vcmp.eq.f32.partialorder %v355_v52, 8.507059e+37 }
  0xb9   : > { %v616_v30 = vpop.eup %615  ;;  %v320_v41 = vadd.f32 %v612_v22, %v319_v31 }
  0xba   : > { %v332_v33 = vmul.f32 %v616_v30, %v299_v21  ;;  %v309_v44 = vsel %vm815_vm5, %v610_v20, %v305_v32  ;;  %vm337_vm7 = vweird.f32 %v616_v30 }
  0xbb   : > { %v314_v54 = vsel %vm311_vm8, %v313_v47, %v309_v44  ;;  %v324_v55 = vsel %vm822_vm10, %v612_v22, %v320_v41  ;;  %vm338_vm11 = vmor %vm336_vm9, %vm337_vm7 }
  0xbc   : > { %v618_v36 = vpop.eup %617  ;;  %v333_v38 = vsub.f32 1.0, %v332_v33  ;;  %v361_v62 = vmul.f32 %v314_v54, %v803_v7  ;;  %v329_v63 = vsel %vm326_vm14, %v328_v57, %v324_v55 }
  0xbd   : > { %v347_v43 = vmul.f32 %v618_v36, %v300_v27  ;;  %vm352_vm12 = vweird.f32 %v618_v36  ;;  %v362_v9 = vmul.f32 %v329_v63, %v805_v8 }
  0xbe   : > { %v334_v45 = vmul.f32 %v616_v30, %v333_v38  ;;  %vm353_vm1 = vmor %vm351_vm15, %vm352_vm12  ;;  %v365_v13 = vmul.f32 %v361_v62, %v250_v3 }
  0xbf   : > { %v348_v48 = vsub.f32 1.0, %v347_v43  ;;  %v366_v15 = vmul.f32 %v362_v9, %v279_v14 }
  0xc0   : > { %v335_v50 = vadd.f32 %v616_v30, %v334_v45 }
  0xc1   : > { %v349_v56 = vmul.f32 %v618_v36, %v348_v48 }
  0xc2   : > { %v339_v58 = vsel %vm338_vm11, %v616_v30, %v335_v50 }
  0xc3   : > { %v344_v59 = vsel %vm341_vm13, %v343_v51, %v339_v58  ;;  %v350_v60 = vadd.f32 %v618_v36, %v349_v56 }
  0xc4   : > { %v363_v0 = vmul.f32 %v344_v59, %v809_v11  ;;  %v369_v11 = vld [vmem:[%s875_s2] sm:$0xf] }
  0xc5   : > { %v354_v2 = vsel %vm353_vm1, %v618_v36, %v350_v60 }
  0xc6   : > { %v359_v4 = vsel %vm356_vm2, %v358_v1, %v354_v2  ;;  %v367_v5 = vmul.f32 %v363_v0, %v253_v61 }
  0xc7   : > { %v364_v10 = vmul.f32 %v359_v4, %v811_v12 }
  0xc8   : > { %388 = vmatpush.msrb.mxu2 %v367_v5 }
  0xc9   : > { %v368_v7 = vmul.f32 %v364_v10, %v282_v6 }
  0xca   : > { %389 = vmatpush.msrb.mxu2 %v365_v13 }
  0xcb   : > { %408 = vmatpush.msrb.mxu3 %v368_v7  ;;  %537 = vmatmul.msk.f32.vlgmr.msrb.gmra.mxu2 %vm370_vm3, %v369_v11 }
  0xcd   : > { %409 = vmatpush.msrb.mxu3 %v366_v15 }
  0xce   : > { %538 = vmatmul.msk.f32.vlgmr.msrb.gmra.mxu3 %vm370_vm3, %v369_v11 }
 0x14e   : > { %v391_v12 = vpop.f32.mrf.mxu2 }
 0x151   : > { %v411_v8 = vpop.f32.mrf.mxu3 }
 0x152   : > { %v416_v16 = vrot.slane %v411_v8, 4 }
 0x154   : > { %v417_v17 = vsel %vm222_vm0, %v391_v12, %v416_v16 }
 0x155   : > { %419 = vst [vmem:[%s188_s30] sm:$0xff] %v417_v17 }
 0x156   : > { %646 = shalt.err (!%p643_p5)
}
 0x157   : > { %548 = dma.vmem_to_hbm [thread:$0]  (%p759_p4), %s437_s4, 128, %s439_s5, %s421_s6  }
 0x158 PF: > { %p554_p6 = scmp.ge.s32.totalorder %s697_s17, 2  ;;  %s450_s19 = sand.u32 1, %s677_s12  }
 0x159   : > { %s451_s21 = scalar_lea.sflag [#allocation3], %s450_s19 }
 0x15a   : > { %p551_p7 = pnand %p554_p6, %p766_p8 }
 0x15c   : > { %p552_p9 = pneg %p551_p7 }
 0x15e   : > { %672 = dma.done.wait (%p552_p9), %s451_s21, 128  }
 0x15f   : > { %674 = vsyncadd (%p552_p9), %s451_s21, 4294967168  ;;  %s16_s17 = sadd.s32 1, %s697_s17   ;;  %s883_s12 = smov %s681_s13 }
 0x160   : > { %p13_p10 = scmp.ge.s32.totalorder %s16_s17, 4   ;;  %s884_s13 = smov %s685_s14 }
 0x161   : > { %s885_s14 = smov %s772_s25  ;;  %s886_s15 = smov %s693_s16 }
 0x162   : > { %s887_s16 = smov %s889_s20  ;;  %15 = sbr.rel (!%p13_p10) target bundleno = 4 (0x4), region = 67 }
 0x167   :  { %457 = vsyncpa [#allocation3], 1 }
 0x168   :  { %459 = vsyncpa [#allocation3 + $0x1], 1 }

</bundles_post_ra>
